<compile_context>
chip_gen: v5e
topology: v5e:2x2
jax: 0.10.0
libtpu: 0.0.40
codegen_flags: <defaults>
</compile_context>

<pallas_src>
import functools

import jax
import jax.numpy as jnp
from jax.experimental import pallas as pl
from jax.experimental.pallas import tpu as pltpu


def _cdiv(a, b):
    return -(-a // b)


def _round_up(x, m):
    return _cdiv(x, m) * m


def _pad2d(a, rows, cols, dtype):
    """Cast to dtype and zero-pad to (rows, cols) only if actually needed."""
    a = a.astype(dtype)
    if a.shape == (rows, cols):
        return a
    out = jnp.zeros((rows, cols), dtype)
    return out.at[: a.shape[0], : a.shape[1]].set(a)


def _head_kernel(x_ref, w_ref, b_ref, y_ref, prob_ref, pred_ref, rloss_ref,
                 *, num_labels, lanes):
    # Fused (one_more_layer -> classifier) matmul:
    # (TB,H) bf16 @ (H,Lp) bf16 with f32 MXU accumulation, f32 bias add.
    logits = jnp.dot(x_ref[...], w_ref[...],
                     preferred_element_type=jnp.float32) + b_ref[...]

    # prob = sigmoid(logits) (EUP); lane-dense writeback in prob_ref's dtype.
    prob_ref[...] = jax.nn.sigmoid(logits).astype(prob_ref.dtype)

    # predictions: (logits > 0) == (sigmoid(logits) > 0.5); int8 writeback.
    pred_ref[...] = (logits > 0.0).astype(jnp.int8)

    # BCE in logits form: max(z,0) - z*y + log1p(exp(-|z|))
    # (== nn.BCELoss(sigmoid(z), y, reduction='none'); torch's -100 clamp is
    # unreachable for |z| << 100).
    y = y_ref[...].astype(jnp.float32)
    z = logits
    losses = jnp.maximum(z, 0.0) - z * y + jnp.log1p(jnp.exp(-jnp.abs(z)))

    if num_labels != lanes:  # trace-time guard: mask padded label lanes only if any
        lane = jax.lax.broadcasted_iota(jnp.int32, losses.shape, dimension=1)
        losses = jnp.where(lane < num_labels, losses, 0.0)

    # Unweighted per-example loss sum; confidence weighting + final mean are
    # O(B) and handled in the wrapper (padded rows excluded by the [:B] slice).
    rloss_ref[...] = jnp.sum(losses, axis=1, keepdims=True)


def classifier_head(hidden_head, w1, b1, wc, bc, labels, weights,
                    *, block_b=512, prob_dtype=jnp.bfloat16):
    """hidden_head (B,H) f32; w1 (H,H); b1 (H,)/(1,H); wc (H,L); bc (L,)/(1,L);
    labels (B,L) in {0,1}; weights (B,) or (B,1) f32.
    Weight matrices are stored transposed vs. PyTorch (in_features, out_features).
    Returns (prob (B,L) prob_dtype, pred (B,L) bool, loss scalar f32)."""
    B, H = hidden_head.shape
    L = wc.shape[1]
    Lp = _round_up(max(L, 128), 128)          # lane-dense label axis

    # Batch tile: multiple of 32 (int8 sublane packing); when B > 32 pick TB so
    # there are at least 2 (even count of) tiles -> both v7x TCs get work.
    block_b = max(32, _round_up(block_b, 32))
    if B <= 32:
        TB = 32
    else:
        pairs = _cdiv(B, 2 * block_b)
        TB = min(block_b, _round_up(_cdiv(B, 2 * pairs), 32))
    Bp = _round_up(B, TB)
    num_tiles = Bp // TB

    # Fold the two bias-only Linears into one (forward-only, no activation in
    # between): logits = x @ (w1 @ wc) + (b1 @ wc + bc).  Done in f32, then
    # the weight is cast to bf16 for the MXU.
    f32 = jnp.float32
    w_fused = jnp.dot(w1.astype(f32), wc.astype(f32))                       # (H, L)
    b_fused = (jnp.dot(jnp.asarray(b1, f32).reshape(1, H), wc.astype(f32))
               + jnp.asarray(bc, f32).reshape(1, L))                        # (1, L)

    x_p = _pad2d(hidden_head, Bp, H, jnp.bfloat16)   # MXU operand (no pad-copy if B==Bp)
    w_p = _pad2d(w_fused, H, Lp, jnp.bfloat16)       # resident fused weight
    b_p = _pad2d(b_fused, 1, Lp, f32)                # resident fused bias
    y_p = _pad2d(labels, Bp, Lp, jnp.int8)           # labels streamed as int8

    batch_map = lambda i: (i, 0)       # tiled over batch
    resident_map = lambda i: (0, 0)    # weights stay resident in VMEM

    prob_isz = jnp.dtype(prob_dtype).itemsize
    cost = pl.CostEstimate(
        flops=2 * Bp * H * Lp,
        transcendentals=3 * Bp * Lp,
        bytes_accessed=(Bp * H * 2 + H * Lp * 2 + Lp * 4
                        + Bp * Lp * (1 + prob_isz + 1) + Bp * 4))
    streamed = TB * H * 2 + TB * Lp * (1 + prob_isz + 1) + TB * 4
    resident = H * Lp * 2 + Lp * 4
    vmem_limit = int(min(max(2 * streamed + resident + (4 << 20), 16 << 20),
                         64 << 20))

    def make_call(resident_pipeline_mode):
        if resident_pipeline_mode is None:
            res_spec = lambda shape: pl.BlockSpec(shape, resident_map)
        else:
            # Constant index_map => operand is DMA'd once; a second pipeline
            # buffer would be pure VMEM waste, so request single buffering.
            res_spec = lambda shape: pl.BlockSpec(
                shape, resident_map, pipeline_mode=resident_pipeline_mode)
        return pl.pallas_call(
            functools.partial(_head_kernel, num_labels=L, lanes=Lp),
            grid=(num_tiles,),
            in_specs=[
                pl.BlockSpec((TB, H), batch_map),    # x
                res_spec((H, Lp)),                   # fused weight (resident)
                res_spec((1, Lp)),                   # fused bias   (resident)
                pl.BlockSpec((TB, Lp), batch_map),   # labels (int8)
            ],
            out_specs=(
                pl.BlockSpec((TB, Lp), batch_map),   # prob
                pl.BlockSpec((TB, Lp), batch_map),   # pred (int8)
                pl.BlockSpec((TB, 1), batch_map),    # per-row loss sum
            ),
            out_shape=(
                jax.ShapeDtypeStruct((Bp, Lp), prob_dtype),
                jax.ShapeDtypeStruct((Bp, Lp), jnp.int8),
                jax.ShapeDtypeStruct((Bp, 1), jnp.float32),
            ),
            compiler_params=pltpu.CompilerParams(
                dimension_semantics=("parallel",),
                vmem_limit_bytes=vmem_limit),
            cost_estimate=cost,
        )

    try:
        prob_p, pred_p, rloss = make_call(pl.Buffered(1))(x_p, w_p, b_p, y_p)
    except Exception:
        # Fallback for JAX builds that reject pipeline_mode / Buffered(1).
        prob_p, pred_p, rloss = make_call(None)(x_p, w_p, b_p, y_p)

    prob = prob_p[:B, :L]
    pred = pred_p[:B, :L].astype(bool)
    w_vec = jnp.asarray(weights, jnp.float32).reshape(-1)
    loss = jnp.sum(rloss[:B, 0] * w_vec) / (B * L)
    return prob, pred, loss


if __name__ == "__main__":
    # Small shapes consistent with the module: batch=8, bert_output_dim=32,
    # num_labels=16, more_linear_mapping=True.
    B, H, L = 8, 32, 16
    key = jax.random.PRNGKey(0)
    k_x, k_w1, k_b1, k_wc, k_bc, k_y, k_wt = jax.random.split(key, 7)

    # TODO(synk): the pretrained BERT/GPT2 utterance_encoder, AdamW/backward
    # step, embedding_noise branch and the avg_pre_prob python loop are not
    # translated; the encoder's CLS output is synthesized here.
    hidden_head = jax.random.normal(k_x, (B, H), dtype=jnp.float32)

    lim = H ** -0.5
    w1 = jax.random.uniform(k_w1, (H, H), jnp.float32, -lim, lim)   # one_more_layer
    b1 = jax.random.uniform(k_b1, (1, H), jnp.float32, -lim, lim)
    wc = jax.random.uniform(k_wc, (H, L), jnp.float32, -lim, lim)   # classifier
    bc = jax.random.uniform(k_bc, (1, L), jnp.float32, -lim, lim)

    labels = (jax.random.uniform(k_y, (B, L)) > 0.5).astype(jnp.float32)
    weights = jax.random.uniform(k_wt, (B,), jnp.float32, 0.5, 1.5)

    prob, pred, loss = classifier_head(hidden_head, w1, b1, wc, bc,
                                       labels, weights)
    jax.block_until_ready((prob, pred, loss))

    # Pure f32 reference (true nn.Linear chain + BCELoss(reduction='none')).
    h_ref = hidden_head @ w1 + b1
    logits_ref = h_ref @ wc + bc
    prob_ref = jax.nn.sigmoid(logits_ref)
    losses_ref = -(labels * jnp.maximum(jnp.log(prob_ref), -100.0)
                   + (1.0 - labels) * jnp.maximum(jnp.log1p(-prob_ref), -100.0))
    loss_ref = jnp.mean(losses_ref * weights[:, None])
    pred_ref = prob_ref > 0.5

    assert jnp.allclose(prob.astype(jnp.float32), prob_ref,
                        atol=2e-2, rtol=2e-2), "prob mismatch"
    assert abs(float(loss) - float(loss_ref)) < 1e-2, "loss mismatch"
    # predictions must agree wherever the decision is not numerically borderline
    agree = (pred == pred_ref) | (jnp.abs(logits_ref) < 5e-2)
    assert bool(jnp.all(agree)), "pred mismatch"

    print("KERNEL_OK")
</pallas_src>

<mosaic_0001>
module attributes {stable_mosaic.version = 11 : i64} {
  func.func @_head_kernel(%arg0: i32, %arg1: memref<32x32xbf16, #tpu.memory_space<vmem>>, %arg2: memref<32x128xbf16, #tpu.memory_space<vmem>>, %arg3: memref<1x128xf32, #tpu.memory_space<vmem>>, %arg4: memref<32x128xi8, #tpu.memory_space<vmem>>, %arg5: memref<32x128xbf16, #tpu.memory_space<vmem>>, %arg6: memref<32x128xi8, #tpu.memory_space<vmem>>, %arg7: memref<32x1xf32, #tpu.memory_space<vmem>>) attributes {dimension_semantics = [#tpu.dimension_semantics<parallel>], iteration_bounds = array<i64: 1>, scalar_prefetch = 0 : i64, scratch_operands = 0 : i64, tpu.core_type = #tpu.core_type<tc>, window_params = [{transform_indices = @transform_0, window_bounds = array<i64: 32, 32>}, {pipeline_mode = #tpu.pipeline_mode<synchronous>, transform_indices = @transform_1, window_bounds = array<i64: 32, 128>}, {pipeline_mode = #tpu.pipeline_mode<synchronous>, transform_indices = @transform_2, window_bounds = array<i64: 1, 128>}, {transform_indices = @transform_3, window_bounds = array<i64: 32, 128>}, {transform_indices = @transform_4, window_bounds = array<i64: 32, 128>}, {transform_indices = @transform_5, window_bounds = array<i64: 32, 128>}, {transform_indices = @transform_6, window_bounds = array<i64: 32, 1>}]} {
    %c0 = arith.constant 0 : index
    %c0_0 = arith.constant 0 : index
    %0 = vector.load %arg1[%c0, %c0_0] : memref<32x32xbf16, #tpu.memory_space<vmem>>, vector<32x32xbf16>
    %c0_1 = arith.constant 0 : index
    %c0_2 = arith.constant 0 : index
    %1 = vector.load %arg2[%c0_1, %c0_2] : memref<32x128xbf16, #tpu.memory_space<vmem>>, vector<32x128xbf16>
    %cst = arith.constant dense<0.000000e+00> : vector<32x128xf32>
    %2 = tpu.matmul %0, %1, %cst {dimension_numbers = #tpu.dot_dimension_numbers<[1], [0], [0], [1], [0, 0, 1, 1], [], []>} : vector<32x32xbf16>, vector<32x128xbf16>, vector<32x128xf32> -> vector<32x128xf32>
    %c0_3 = arith.constant 0 : index
    %c0_4 = arith.constant 0 : index
    %3 = vector.load %arg3[%c0_3, %c0_4] : memref<1x128xf32, #tpu.memory_space<vmem>>, vector<1x128xf32>
    %4 = vector.broadcast %3 : vector<1x128xf32> to vector<32x128xf32>
    %5 = arith.addf %2, %4 : vector<32x128xf32>
    %6 = arith.negf %5 : vector<32x128xf32>
    %7 = math.exp %6 : vector<32x128xf32>
    %cst_5 = arith.constant 1.000000e+00 : f32
    %8 = vector.broadcast %cst_5 : f32 to vector<32x128xf32>
    %9 = arith.addf %8, %7 : vector<32x128xf32>
    %10 = arith.divf %8, %9 : vector<32x128xf32>
    %11 = arith.truncf %10 : vector<32x128xf32> to vector<32x128xbf16>
    %c0_6 = arith.constant 0 : index
    %c0_7 = arith.constant 0 : index
    %12 = vector.load %arg5[%c0_6, %c0_7] : memref<32x128xbf16, #tpu.memory_space<vmem>>, vector<32x128xbf16>
    tpu.vector_store %arg5[%c0_6, %c0_7], %11 {strides = array<i32>} : memref<32x128xbf16, #tpu.memory_space<vmem>>, vector<32x128xbf16>,
    %cst_8 = arith.constant 0.000000e+00 : f32
    %13 = vector.broadcast %cst_8 : f32 to vector<32x128xf32>
    %14 = arith.cmpf ogt, %5, %13 : vector<32x128xf32>
    %15 = arith.extui %14 : vector<32x128xi1> to vector<32x128xi8>
    %c0_9 = arith.constant 0 : index
    %c0_10 = arith.constant 0 : index
    %16 = vector.load %arg6[%c0_9, %c0_10] : memref<32x128xi8, #tpu.memory_space<vmem>>, vector<32x128xi8>
    tpu.vector_store %arg6[%c0_9, %c0_10], %15 {strides = array<i32>} : memref<32x128xi8, #tpu.memory_space<vmem>>, vector<32x128xi8>,
    %c0_11 = arith.constant 0 : index
    %c0_12 = arith.constant 0 : index
    %17 = vector.load %arg4[%c0_11, %c0_12] : memref<32x128xi8, #tpu.memory_space<vmem>>, vector<32x128xi8>
    %18 = arith.sitofp %17 : vector<32x128xi8> to vector<32x128xf32>
    %cst_13 = arith.constant 0.000000e+00 : f32
    %19 = vector.broadcast %cst_13 : f32 to vector<32x128xf32>
    %20 = arith.maximumf %5, %19 : vector<32x128xf32>
    %21 = arith.mulf %5, %18 : vector<32x128xf32>
    %22 = arith.subf %20, %21 : vector<32x128xf32>
    %23 = math.absf %5 : vector<32x128xf32>
    %cst_14 = arith.constant 0.000000e+00 : f32
    %24 = vector.broadcast %cst_14 : f32 to vector<32x128xf32>
    %25 = arith.subf %24, %23 : vector<32x128xf32>
    %26 = math.exp %25 : vector<32x128xf32>
    %27 = math.log1p %26 : vector<32x128xf32>
    %28 = arith.addf %22, %27 : vector<32x128xf32>
    %29 = tpu.iota {dimensions = array<i32: 1>} : vector<32x128xi32>
    %c16_i32 = arith.constant 16 : i32
    %30 = vector.broadcast %c16_i32 : i32 to vector<32x128xi32>
    %31 = arith.cmpi slt, %29, %30 : vector<32x128xi32>
    %cst_15 = arith.constant 0.000000e+00 : f32
    %32 = vector.broadcast %cst_15 : f32 to vector<32x128xf32>
    %33 = arith.select %31, %28, %32 : vector<32x128xi1>, vector<32x128xf32>
    %cst_16 = arith.constant dense<0.000000e+00> : vector<32xf32>
    %34 = vector.multi_reduction <add>, %33, %cst_16 [1] : vector<32x128xf32> to vector<32xf32>
    %35 = vector.shape_cast %34 : vector<32xf32> to vector<32x1xf32>
    %c0_17 = arith.constant 0 : index
    %c0_18 = arith.constant 0 : index
    %36 = vector.load %arg7[%c0_17, %c0_18] : memref<32x1xf32, #tpu.memory_space<vmem>>, vector<32x1xf32>
    tpu.vector_store %arg7[%c0_17, %c0_18], %35 {strides = array<i32>} : memref<32x1xf32, #tpu.memory_space<vmem>>, vector<32x1xf32>,
    return
  }
  func.func @transform_0(%arg0: i32) -> (i32, i32) {
    %c0_i32 = arith.constant 0 : i32
    %c0_i32_0 = arith.constant 0 : i32
    return %arg0, %c0_i32 : i32, i32
  }
  func.func @transform_1(%arg0: i32) -> (i32, i32) {
    %c0_i32 = arith.constant 0 : i32
    %c0_i32_0 = arith.constant 0 : i32
    %c0_i32_1 = arith.constant 0 : i32
    return %c0_i32, %c0_i32_0 : i32, i32
  }
  func.func @transform_2(%arg0: i32) -> (i32, i32) {
    %c0_i32 = arith.constant 0 : i32
    %c0_i32_0 = arith.constant 0 : i32
    %c0_i32_1 = arith.constant 0 : i32
    return %c0_i32, %c0_i32_0 : i32, i32
  }
  func.func @transform_3(%arg0: i32) -> (i32, i32) {
    %c0_i32 = arith.constant 0 : i32
    %c0_i32_0 = arith.constant 0 : i32
    return %arg0, %c0_i32 : i32, i32
  }
  func.func @transform_4(%arg0: i32) -> (i32, i32) {
    %c0_i32 = arith.constant 0 : i32
    %c0_i32_0 = arith.constant 0 : i32
    return %arg0, %c0_i32 : i32, i32
  }
  func.func @transform_5(%arg0: i32) -> (i32, i32) {
    %c0_i32 = arith.constant 0 : i32
    %c0_i32_0 = arith.constant 0 : i32
    return %arg0, %c0_i32 : i32, i32
  }
  func.func @transform_6(%arg0: i32) -> (i32, i32) {
    %c0_i32 = arith.constant 0 : i32
    %c0_i32_0 = arith.constant 0 : i32
    return %arg0, %c0_i32 : i32, i32
  }
}

module attributes {stable_mosaic.version = 11 : i64} {
  func.func @_head_kernel(%arg0: i32, %arg1: memref<32x32xbf16, #tpu.memory_space<vmem>>, %arg2: memref<32x128xbf16, #tpu.memory_space<vmem>>, %arg3: memref<1x128xf32, #tpu.memory_space<vmem>>, %arg4: memref<32x128xi8, #tpu.memory_space<vmem>>, %arg5: memref<32x128xbf16, #tpu.memory_space<vmem>>, %arg6: memref<32x128xi8, #tpu.memory_space<vmem>>, %arg7: memref<32x1xf32, #tpu.memory_space<vmem>>) attributes {dimension_semantics = [#tpu.dimension_semantics<parallel>], iteration_bounds = array<i64: 1>, scalar_prefetch = 0 : i64, scratch_operands = 0 : i64, tpu.core_type = #tpu.core_type<tc>, window_params = [{transform_indices = @transform_0, window_bounds = array<i64: 32, 32>}, {pipeline_mode = #tpu.pipeline_mode<synchronous>, transform_indices = @transform_1, window_bounds = array<i64: 32, 128>}, {pipeline_mode = #tpu.pipeline_mode<synchronous>, transform_indices = @transform_2, window_bounds = array<i64: 1, 128>}, {transform_indices = @transform_3, window_bounds = array<i64: 32, 128>}, {transform_indices = @transform_4, window_bounds = array<i64: 32, 128>}, {transform_indices = @transform_5, window_bounds = array<i64: 32, 128>}, {transform_indices = @transform_6, window_bounds = array<i64: 32, 1>}]} {
    %c0 = arith.constant 0 : index
    %c0_0 = arith.constant 0 : index
    %0 = vector.load %arg1[%c0, %c0_0] : memref<32x32xbf16, #tpu.memory_space<vmem>>, vector<32x32xbf16>
    %c0_1 = arith.constant 0 : index
    %c0_2 = arith.constant 0 : index
    %1 = vector.load %arg2[%c0_1, %c0_2] : memref<32x128xbf16, #tpu.memory_space<vmem>>, vector<32x128xbf16>
    %cst = arith.constant dense<0.000000e+00> : vector<32x128xf32>
    %2 = tpu.matmul %0, %1, %cst {dimension_numbers = #tpu.dot_dimension_numbers<[1], [0], [0], [1], [0, 0, 1, 1], [], []>} : vector<32x32xbf16>, vector<32x128xbf16>, vector<32x128xf32> -> vector<32x128xf32>
    %c0_3 = arith.constant 0 : index
    %c0_4 = arith.constant 0 : index
    %3 = vector.load %arg3[%c0_3, %c0_4] : memref<1x128xf32, #tpu.memory_space<vmem>>, vector<1x128xf32>
    %4 = vector.broadcast %3 : vector<1x128xf32> to vector<32x128xf32>
    %5 = arith.addf %2, %4 : vector<32x128xf32>
    %6 = arith.negf %5 : vector<32x128xf32>
    %7 = math.exp %6 : vector<32x128xf32>
    %cst_5 = arith.constant 1.000000e+00 : f32
    %8 = vector.broadcast %cst_5 : f32 to vector<32x128xf32>
    %9 = arith.addf %8, %7 : vector<32x128xf32>
    %10 = arith.divf %8, %9 : vector<32x128xf32>
    %11 = arith.truncf %10 : vector<32x128xf32> to vector<32x128xbf16>
    %c0_6 = arith.constant 0 : index
    %c0_7 = arith.constant 0 : index
    %12 = vector.load %arg5[%c0_6, %c0_7] : memref<32x128xbf16, #tpu.memory_space<vmem>>, vector<32x128xbf16>
    tpu.vector_store %arg5[%c0_6, %c0_7], %11 {strides = array<i32>} : memref<32x128xbf16, #tpu.memory_space<vmem>>, vector<32x128xbf16>,
    %cst_8 = arith.constant 0.000000e+00 : f32
    %13 = vector.broadcast %cst_8 : f32 to vector<32x128xf32>
    %14 = arith.cmpf ogt, %5, %13 : vector<32x128xf32>
    %15 = arith.extui %14 : vector<32x128xi1> to vector<32x128xi8>
    %c0_9 = arith.constant 0 : index
    %c0_10 = arith.constant 0 : index
    %16 = vector.load %arg6[%c0_9, %c0_10] : memref<32x128xi8, #tpu.memory_space<vmem>>, vector<32x128xi8>
    tpu.vector_store %arg6[%c0_9, %c0_10], %15 {strides = array<i32>} : memref<32x128xi8, #tpu.memory_space<vmem>>, vector<32x128xi8>,
    %c0_11 = arith.constant 0 : index
    %c0_12 = arith.constant 0 : index
    %17 = vector.load %arg4[%c0_11, %c0_12] : memref<32x128xi8, #tpu.memory_space<vmem>>, vector<32x128xi8>
    %18 = arith.sitofp %17 : vector<32x128xi8> to vector<32x128xf32>
    %cst_13 = arith.constant 0.000000e+00 : f32
    %19 = vector.broadcast %cst_13 : f32 to vector<32x128xf32>
    %20 = arith.maximumf %5, %19 : vector<32x128xf32>
    %21 = arith.mulf %5, %18 : vector<32x128xf32>
    %22 = arith.subf %20, %21 : vector<32x128xf32>
    %23 = math.absf %5 : vector<32x128xf32>
    %cst_14 = arith.constant 0.000000e+00 : f32
    %24 = vector.broadcast %cst_14 : f32 to vector<32x128xf32>
    %25 = arith.subf %24, %23 : vector<32x128xf32>
    %26 = math.exp %25 : vector<32x128xf32>
    %27 = math.log1p %26 : vector<32x128xf32>
    %28 = arith.addf %22, %27 : vector<32x128xf32>
    %29 = tpu.iota {dimensions = array<i32: 1>} : vector<32x128xi32>
    %c16_i32 = arith.constant 16 : i32
    %30 = vector.broadcast %c16_i32 : i32 to vector<32x128xi32>
    %31 = arith.cmpi slt, %29, %30 : vector<32x128xi32>
    %cst_15 = arith.constant 0.000000e+00 : f32
    %32 = vector.broadcast %cst_15 : f32 to vector<32x128xf32>
    %33 = arith.select %31, %28, %32 : vector<32x128xi1>, vector<32x128xf32>
    %cst_16 = arith.constant dense<0.000000e+00> : vector<32xf32>
    %34 = vector.multi_reduction <add>, %33, %cst_16 [1] : vector<32x128xf32> to vector<32xf32>
    %35 = vector.shape_cast %34 : vector<32xf32> to vector<32x1xf32>
    %c0_17 = arith.constant 0 : index
    %c0_18 = arith.constant 0 : index
    %36 = vector.load %arg7[%c0_17, %c0_18] : memref<32x1xf32, #tpu.memory_space<vmem>>, vector<32x1xf32>
    tpu.vector_store %arg7[%c0_17, %c0_18], %35 {strides = array<i32>} : memref<32x1xf32, #tpu.memory_space<vmem>>, vector<32x1xf32>,
    return
  }
  func.func @transform_0(%arg0: i32) -> (i32, i32) {
    %c0_i32 = arith.constant 0 : i32
    %c0_i32_0 = arith.constant 0 : i32
    return %arg0, %c0_i32 : i32, i32
  }
  func.func @transform_1(%arg0: i32) -> (i32, i32) {
    %c0_i32 = arith.constant 0 : i32
    %c0_i32_0 = arith.constant 0 : i32
    %c0_i32_1 = arith.constant 0 : i32
    return %c0_i32, %c0_i32_0 : i32, i32
  }
  func.func @transform_2(%arg0: i32) -> (i32, i32) {
    %c0_i32 = arith.constant 0 : i32
    %c0_i32_0 = arith.constant 0 : i32
    %c0_i32_1 = arith.constant 0 : i32
    return %c0_i32, %c0_i32_0 : i32, i32
  }
  func.func @transform_3(%arg0: i32) -> (i32, i32) {
    %c0_i32 = arith.constant 0 : i32
    %c0_i32_0 = arith.constant 0 : i32
    return %arg0, %c0_i32 : i32, i32
  }
  func.func @transform_4(%arg0: i32) -> (i32, i32) {
    %c0_i32 = arith.constant 0 : i32
    %c0_i32_0 = arith.constant 0 : i32
    return %arg0, %c0_i32 : i32, i32
  }
  func.func @transform_5(%arg0: i32) -> (i32, i32) {
    %c0_i32 = arith.constant 0 : i32
    %c0_i32_0 = arith.constant 0 : i32
    return %arg0, %c0_i32 : i32, i32
  }
  func.func @transform_6(%arg0: i32) -> (i32, i32) {
    %c0_i32 = arith.constant 0 : i32
    %c0_i32_0 = arith.constant 0 : i32
    return %arg0, %c0_i32 : i32, i32
  }
}

</mosaic_0001>

<bundles_post_ra>
// kernel: tpu_custom_call.1
= control target key start
LH: loop header
LB: loop body
LE: loop exit
PB: predicated region body
PF: predicated region fallthrough
CT: control target
= control target key end

     0   :  { %12 = vsyncpa [#allocation3], 0  ;;  %s811_s0 = inlined_call_operand.hbm [shape: bf16[32,32], index: 0, kind: input, shape index: {}]   ;;  %s812_s1 = inlined_call_operand.hbm [shape: bf16[32,128], index: 1, kind: input, shape index: {}]   ;;  %s813_s2 = inlined_call_operand.vmem [shape: f32[1,128], index: 2, kind: input, shape index: {}]   ;;  %s814_s3 = inlined_call_operand.hbm [shape: s8[32,128], index: 3, kind: input, shape index: {}]   ;;  %s815_s4 = inlined_call_operand.hbm [shape: bf16[32,128], index: 4, kind: output, shape index: {0}]   ;;  %s816_s5 = inlined_call_operand.hbm [shape: s8[32,128], index: 5, kind: output, shape index: {1}]   ;;  %s817_s6 = inlined_call_operand.vmem [shape: f32[32,1], index: 6, kind: output, shape index: {2}]  }
   0x1   :  { %13 = vsyncpa [#allocation6], 0 }
   0x2   :  { %14 = vsyncpa [#allocation4], 0 }
   0x3   :  { %15 = vsyncpa [#allocation10], 0  ;;  %s33_s23 = sshll.u32 %s812_s1, 4  ;;  %s571_s24 = smov [#allocation5]   ;;  %s34_s23 = int_to_ptr.hbm [resolvable:$true] %s33_s23 }
   0x4   :  { %s35_s25 = sshll.u32 %s571_s24, 4  ;;  %s20_s28 = sshll.u32 %s811_s0, 4  ;;  %s36_s25 = int_to_ptr.vmem [resolvable:$true] %s35_s25  ;;  %s21_s28 = int_to_ptr.hbm [resolvable:$true] %s20_s28 }
   0x5   :  { %s572_s29 = smov 64   ;;  %s573_s30 = smov 4  }
   0x6   :  { %41 = dma.hbm_to_vmem [thread:$0]  %s34_s23, 256, %s36_s25, [#allocation6], %s572_s29, %s572_s29, %s573_s30  }
   0x7   :  { %s574_s7 = smov [#allocation2]   ;;  %s49_s1 = sshll.u32 %s814_s3, 4  ;;  %s50_s1 = int_to_ptr.hbm [resolvable:$true] %s49_s1 }
   0x8   :  { %s22_s8 = sshll.u32 %s574_s7, 4  ;;  %s575_s0 = smov [#allocation7]   ;;  %s23_s8 = int_to_ptr.vmem [resolvable:$true] %s22_s8 }
   0x9   :  { %28 = dma.hbm_to_vmem [thread:$0]  %s21_s28, 256, %s23_s8, [#allocation3], %s572_s29, %s572_s29, %s573_s30  }
   0xa   :  { %s51_s11 = sshll.u32 %s575_s0, 4  ;;  %s52_s11 = int_to_ptr.vmem [resolvable:$true] %s51_s11 }
   0xb   :  { %54 = dma.hbm_to_vmem [thread:$0]  %s50_s1, 128, %s52_s11, [#allocation6]  }
   0xc   :  { %563 = dma.done.wait [#allocation3], 256  }
   0xd   :  { %564 = vsyncadd [#allocation3], 4294967040 }
   0xe   :  { %565 = dma.done.wait [#allocation6], 384  }
   0xf   :  { %566 = vsyncadd [#allocation6], 4294966912  ;;  %v388_v0 = vld [vmem:[#allocation5 + $0x8] sm:$0xff]  ;;  %v387_v1 = vld [vmem:[#allocation5] sm:$0xff]  ;;  %vm104_vm0 = vcmask 261120   ;;  %v303_v22 = vlaneseq  ;;  %s329_s14 = sshll.u32 %s815_s4, 4  ;;  %s330_s14 = int_to_ptr.hbm [resolvable:$true] %s329_s14 }
  0x10   :  { %117 = vmatpush.bf16.msra.mxu0 %v388_v0  ;;  %400 = vmatpush.bf16.msra.mxu1 %v388_v0  ;;  %v385_v2 = vld [vmem:[#allocation2] sm:$0xff]  ;;  %v386_v3 = vld [vmem:[#allocation2 + $0x8] sm:$0xff]  ;;  %s576_s15 = smov [#allocation8]   ;;  %s578_s4 = smov [#allocation9]  }
  0x11   :  { %v410_v4 = vld [vmem:[%s813_s2] ss:$0 sm:$0xff]  ;;  %v647_v35 = vand.u32 127, %v303_v22  ;;  %s327_s16 = sshll.u32 %s576_s15, 4  ;;  %s341_s17 = sshll.u32 %s578_s4, 4  ;;  %s328_s16 = int_to_ptr.vmem [resolvable:$true] %s327_s16  ;;  %s342_s17 = int_to_ptr.vmem [resolvable:$true] %s341_s17 }
  0x12   :  { %v226_v7 = vld [vmem:[#allocation7] sm:$0xff]  ;;  %s343_s20 = sshll.u32 %s816_s5, 4  ;;  %s344_s20 = int_to_ptr.hbm [resolvable:$true] %s343_s20 }
  0x13   :  { %v229_v13 = vunpack.c.2.s8 %v226_v7  ;;  %v227_v16 = vunpack.c.0.s8 %v226_v7  ;;  %v230_v18 = vunpack.c.3.s8 %v226_v7  ;;  %v228_v19 = vunpack.c.1.s8 %v226_v7 }
  0x14   :  { %118 = vmatpush.bf16.msra.mxu0 %v387_v1  ;;  %401 = vmatpush.bf16.msra.mxu1 %v387_v1  ;;  %vm305_vm1 = vcmp.lt.s32.totalorder %v647_v35, 16 }
  0x15   :  { %v233_v21 = vcvt.s32.f32 %v229_v13  ;;  %v231_v28 = vcvt.s32.f32 %v227_v16  ;;  %v234_v29 = vcvt.s32.f32 %v230_v18  ;;  %v232_v30 = vcvt.s32.f32 %v228_v19 }
  0x17   :  { %379 = vmatmul.msk.bf16.vlgmr.msra.gmra.mxu0 %vm104_vm0, %v385_v2  ;;  %380 = vmatmul.msk.bf16.vlgmr.msra.gmra.mxu1 %vm104_vm0, %v386_v3 }
  0x94   :  { %v120_v5 = vpop.f32.mrf.mxu0  ;;  %v125_v6 = vpop.f32.mrf.mxu1 }
  0x95   :  { %v632_v8 = vadd.f32 %v410_v4, %v120_v5  ;;  %v634_v9 = vadd.f32 %v410_v4, %v125_v6 }
  0x97   :  { %v381_v10 = vmul.f32 -1.442695, %v632_v8  ;;  %v247_v11 = vand.u32 2147483647, %v632_v8  ;;  %v383_v12 = vmul.f32 -1.442695, %v634_v9  ;;  %v241_v34 = vmul.f32 %v233_v21, %v634_v9 }
  0x98   :  { %v249_v14 = vand.u32 2147483647, %v634_v9  ;;  %v237_v40 = vmax.f32 %v634_v9, 0.0  ;;  %v235_v43 = vmax.f32 %v632_v8, 0.0  ;;  %v239_v45 = vmul.f32 %v231_v28, %v632_v8 }
  0x99   :  { %411 = vpow2.f32 %v381_v10  ;;  %v251_v15 = vsub.f32 0.0, %v247_v11 }
  0x9a   :  { %413 = vpow2.f32 %v383_v12  ;;  %v253_v17 = vsub.f32 0.0, %v249_v14  ;;  %v245_v62 = vsub.f32 %v237_v40, %v241_v34  ;;  %v243_v3 = vsub.f32 %v235_v43, %v239_v45 }
  0x9b   :  { %v255_v20 = vmul.f32 1.442695, %v251_v15 }
  0x9c   :  { %v259_v23 = vmul.f32 1.442695, %v253_v17  ;;  %v122_v24 = vpop.f32.mrf.mxu0  ;;  %v127_v25 = vpop.f32.mrf.mxu1 }
  0x9d   :  { %415 = vpow2.f32 %v255_v20  ;;  %v640_v26 = vadd.f32 %v410_v4, %v122_v24  ;;  %v642_v27 = vadd.f32 %v410_v4, %v127_v25 }
  0x9e   :  { %417 = vpow2.f32 %v259_v23 }
  0x9f   :  { %v412_v31 = vpop.eup %411  ;;  %v382_v32 = vmul.f32 -1.442695, %v640_v26  ;;  %v248_v33 = vand.u32 2147483647, %v640_v26  ;;  %v384_v38 = vmul.f32 -1.442695, %v642_v27  ;;  %v242_v46 = vmul.f32 %v234_v29, %v642_v27 }
  0xa0   :  { %v414_v36 = vpop.eup %413  ;;  %v649_v37 = vadd.f32 1.0, %v412_v31  ;;  %v250_v39 = vand.u32 2147483647, %v642_v27  ;;  %v238_v49 = vmax.f32 %v642_v27, 0.0  ;;  %v236_v50 = vmax.f32 %v640_v26, 0.0 }
  0xa1   :  { %v654_v41 = vadd.f32 1.0, %v414_v36  ;;  %419 = vpow2.f32 %v382_v32  ;;  %v252_v42 = vsub.f32 0.0, %v248_v33  ;;  %v240_v57 = vmul.f32 %v232_v30, %v640_v26 }
  0xa2   :  { %421 = vrcp.f32 %v649_v37  ;;  %v254_v44 = vsub.f32 0.0, %v250_v39  ;;  %v157_v0 = vand.u32 2147483648, %v649_v37  ;;  %v672_v5 = vsub.f32 %v238_v49, %v242_v46 }
  0xa3   :  { %v416_v47 = vpop.eup %415  ;;  %423 = vrcp.f32 %v654_v41  ;;  %v257_v48 = vmul.f32 1.442695, %v252_v42  ;;  %v674_v6 = vsub.f32 %v236_v50, %v240_v57  ;;  %v155_v10 = vand.u32 2147483647, %v649_v37 }
  0xa4   :  { %v418_v51 = vpop.eup %417  ;;  %425 = vpow2.f32 %v384_v38  ;;  %v261_v52 = vmul.f32 1.442695, %v254_v44  ;;  %v263_v53 = vadd.f32 1.0, %v416_v47  ;;  %v266_v54 = vmul.f32 -0.5, %v416_v47 }
  0xa5   :  { %427 = vpow2.f32 %v257_v48  ;;  %v281_v55 = vadd.f32 1.0, %v418_v51  ;;  %v284_v56 = vmul.f32 -0.5, %v418_v51  ;;  %v287_v58 = vand.u32 2147483647, %v418_v51 }
  0xa6   :  { %429 = vpow2.f32 %v261_v52  ;;  %v267_v59 = vadd.f32 1.0, %v266_v54  ;;  %v269_v60 = vand.u32 2147483647, %v416_v47  ;;  %vm151_vm4 = vweird.f32 %v649_v37 }
  0xa7   :  { %v420_v61 = vpop.eup %419  ;;  %431 = vlog2.f32 %v281_v55  ;;  %v285_v63 = vadd.f32 1.0, %v284_v56  ;;  %vm680_vm2 = vcmp.lt.f32.partialorder %v287_v58, 0.0004427343  ;;  %v158_v18 = vor.u32 1.1754944e-38, %v157_v0 }
  0xa8   :  { %v665_v1 = vpop.eup %421  ;;  %v667_v2 = vadd.f32 1.0, %v420_v61  ;;  %433 = vlog2.f32 %v263_v53  ;;  %v268_v13 = vmul.f32 %v416_v47, %v267_v59  ;;  %vm684_vm3 = vcmp.lt.f32.partialorder %v269_v60, 0.0004427343 }
  0xa9   :  { %v670_v4 = vpop.eup %423  ;;  %v147_v7 = vmul.f32 %v665_v1, %v649_v37  ;;  %v286_v17 = vmul.f32 %v418_v51, %v285_v63  ;;  %vm152_vm5 = vweird.f32 %v665_v1  ;;  %vm694_vm6 = vcmp.eq.f32.partialorder %v155_v10, 8.507059e+37 }
  0xaa   :  { %v426_v11 = vpop.eup %425  ;;  %435 = vrcp.f32 %v667_v2  ;;  %v170_v23 = vand.u32 2147483647, %v667_v2  ;;  %v177_v34 = vmul.f32 %v670_v4, %v654_v41  ;;  %v172_v39 = vand.u32 2147483648, %v667_v2  ;;  %vm730_vm12 = vmor %vm151_vm4, %vm152_vm5 }
  0xab   :  { %v428_v15 = vpop.eup %427  ;;  %v689_v16 = vadd.f32 1.0, %v426_v11  ;;  %v148_v22 = vsub.f32 1.0, %v147_v7  ;;  %vm166_vm7 = vweird.f32 %v667_v2  ;;  %vm181_vm10 = vweird.f32 %v654_v41 }
  0xac   :  { %v430_v19 = vpop.eup %429  ;;  %v272_v20 = vadd.f32 1.0, %v428_v15  ;;  %v275_v21 = vmul.f32 -0.5, %v428_v15  ;;  %v278_v29 = vand.u32 2147483647, %v428_v15  ;;  %vm712_vm9 = vcmp.eq.f32.partialorder %v170_v23, 8.507059e+37 }
  0xad   :  { %v432_v24 = vpop.eup %431  ;;  %437 = vrcp.f32 %v689_v16  ;;  %v290_v25 = vadd.f32 1.0, %v430_v19  ;;  %v293_v28 = vmul.f32 -0.5, %v430_v19  ;;  %v296_v32 = vand.u32 2147483647, %v430_v19 }
  0xae   :  { %v434_v30 = vpop.eup %433  ;;  %v283_v31 = vmul.f32 0.6931472, %v432_v24  ;;  %439 = vlog2.f32 %v272_v20  ;;  %v276_v38 = vadd.f32 1.0, %v275_v21  ;;  %v149_v44 = vmul.f32 %v665_v1, %v148_v22 }
  0xaf   :  { %v265_v36 = vmul.f32 0.6931472, %v434_v30  ;;  %441 = vlog2.f32 %v290_v25  ;;  %v294_v43 = vadd.f32 1.0, %v293_v28  ;;  %vm707_vm8 = vcmp.lt.f32.partialorder %v278_v29, 0.0004427343 }
  0xb0   :  { %v436_v40 = vpop.eup %435  ;;  %v289_v42 = vsel %vm680_vm2, %v286_v17, %v283_v31  ;;  %vm717_vm11 = vcmp.lt.f32.partialorder %v296_v32, 0.0004427343  ;;  %v150_v52 = vadd.f32 %v665_v1, %v149_v44  ;;  %v178_v53 = vsub.f32 1.0, %v177_v34 }
  0xb1   :  { %v301_v45 = vadd.f32 %v289_v42, %v245_v62  ;;  %v271_v46 = vsel %vm684_vm3, %v268_v13, %v265_v36  ;;  %v162_v48 = vmul.f32 %v436_v40, %v667_v2  ;;  %v277_v56 = vmul.f32 %v428_v15, %v276_v38 }
  0xb2   :  { %v299_v50 = vadd.f32 %v271_v46, %v243_v3  ;;  %v173_v59 = vor.u32 1.1754944e-38, %v172_v39  ;;  %v295_v62 = vmul.f32 %v430_v19, %v294_v43  ;;  %v154_v63 = vsel %vm730_vm12, %v665_v1, %v150_v52 }
  0xb3   :  { %v722_v54 = vpop.eup %437  ;;  %v308_v55 = vsel %vm305_vm1, %v301_v45, 0.0  ;;  %v163_v58 = vsub.f32 1.0, %v162_v48  ;;  %v179_v0 = vmul.f32 %v670_v4, %v178_v53  ;;  %vm167_vm13 = vweird.f32 %v436_v40 }
  0xb4   :  { %v440_v60 = vpop.eup %439  ;;  %314 = vadd.xlane.f32.xlu1 %v308_v55  ;;  %v306_v61 = vsel %vm305_vm1, %v299_v50, 0.0  ;;  %vm182_vm14 = vweird.f32 %v670_v4  ;;  %v185_v11 = vand.u32 2147483647, %v654_v41  ;;  %v187_v12 = vand.u32 2147483648, %v654_v41  ;;  %vm168_vm15 = vmor %vm166_vm7, %vm167_vm13 }
  0xb5   :  { %v442_v3 = vpop.eup %441  ;;  %310 = vadd.xlane.f32.xlu0 %v306_v61  ;;  %v274_v37 = vmul.f32 0.6931472, %v440_v60  ;;  %v164_v7 = vmul.f32 %v436_v40, %v163_v58  ;;  %v192_v13 = vmul.f32 %v722_v54, %v689_v16  ;;  %v159_v14 = vsel %vm694_vm6, %v158_v18, %v154_v63  ;;  %vm767_vm3 = vmor %vm181_vm10, %vm182_vm14 }
  0xb6   :  { %v292_v10 = vmul.f32 0.6931472, %v442_v3  ;;  %v180_v17 = vadd.f32 %v670_v4, %v179_v0  ;;  %vm197_vm0 = vweird.f32 %v722_v54  ;;  %vm196_vm2 = vweird.f32 %v689_v16 }
  0xb7   :  { %v280_v1 = vsel %vm707_vm8, %v277_v56, %v274_v37  ;;  %v165_v15 = vadd.f32 %v436_v40, %v164_v7  ;;  %v193_v21 = vsub.f32 1.0, %v192_v13  ;;  %v200_v18 = vand.u32 2147483647, %v689_v16  ;;  %vm775_vm4 = vmor %vm196_vm2, %vm197_vm0 }
  0xb8   :  { %v298_v19 = vsel %vm717_vm11, %v295_v62, %v292_v10  ;;  %v300_v20 = vadd.f32 %v280_v1, %v674_v6  ;;  %v202_v6 = vand.u32 2147483648, %v689_v16  ;;  %vm214_vm5 = vcmp.gt.f32.partialorder %v632_v8, 0.0 }
  0xb9   :  { %v302_v22 = vadd.f32 %v298_v19, %v672_v5  ;;  %v169_v23 = vsel %vm168_vm15, %v436_v40, %v165_v15  ;;  %v194_v5 = vmul.f32 %v722_v54, %v193_v21  ;;  %vm215_vm6 = vcmp.gt.f32.partialorder %v640_v26, 0.0 }
  0xba   :  { %v307_v24 = vsel %vm305_vm1, %v300_v20, 0.0  ;;  %v174_v25 = vsel %vm712_vm9, %v173_v59, %v169_v23  ;;  %v184_v41 = vsel %vm767_vm3, %v670_v4, %v180_v17  ;;  %vm217_vm7 = vcmp.gt.f32.partialorder %v642_v27, 0.0  ;;  %vm218_vm8 = vmpackc.low %vm215_vm6, %vm214_vm5 }
  0xbb   :  { %v309_v28 = vsel %vm305_vm1, %v302_v22, 0.0  ;;  %v392_v30 = vpack.c.bf16 %v174_v25, %v159_v14  ;;  %v195_v31 = vadd.f32 %v722_v54, %v194_v5  ;;  %vm216_vm1 = vcmp.gt.f32.partialorder %v634_v9, 0.0 }
  0xbc   :  { %316 = vadd.xlane.f32.xlu1 %v309_v28  ;;  %v188_v8 = vor.u32 1.1754944e-38, %v187_v12  ;;  %v203_v35 = vor.u32 1.1754944e-38, %v202_v6  ;;  %vm219_vm9 = vmpackc.low %vm217_vm7, %vm216_vm1  ;;  %v577_v26 = vmov 0   ;;  %vm186_vm10 = vcmp.eq.f32.partialorder %v185_v11, 8.507059e+37 }
  0xbd   :  { %312 = vadd.xlane.f32.xlu0 %v307_v24  ;;  %393 = vst [vmem:[#allocation8] sm:$0xff] %v392_v30   ;;  %v220_v4 = vsel %vm218_vm8, 16711935, %v577_v26  ;;  %v199_v16 = vsel %vm775_vm4, %v722_v54, %v195_v31  ;;  %vm201_vm11 = vcmp.eq.f32.partialorder %v200_v18, 8.507059e+37  ;;  %v221_v32 = vsel %vm219_vm9, 16711935, %v577_v26 }
  0xbe   :  { %v189_v9 = vsel %vm186_vm10, %v188_v8, %v184_v41  ;;  %v204_v27 = vsel %vm201_vm11, %v203_v35, %v199_v16  ;;  %v222_v33 = vpack.c.b8 %v221_v32, %v220_v4  ;;  %vm318_vm13 = vcmask 7168  }
  0xbf   :  { %v397_v34 = vpack.c.bf16 %v204_v27, %v189_v9 }
  0xc0   :  { %vm223_vm12 = vnez %v222_v33 }
  0xc1   :  { %399 = vst [vmem:[#allocation8 + $0x8] sm:$0xff] %v397_v34   ;;  %v224_v36 = vsel %vm223_vm12, 16843009, %v577_v26 }
  0xc2   :  { %335 = dma.vmem_to_hbm [thread:$0]  %s328_s16, 256, %s330_s14, [#allocation4], %s572_s29, %s572_s29, %s573_s30   ;;  %225 = vst [vmem:[#allocation9] sm:$0xff] %v224_v36 }
  0xc3   :  { %346 = dma.vmem_to_hbm [thread:$0]  %s342_s17, 128, %s344_s20, [#allocation10]  }
 0x127   :  { %v315_v38 = vpop.xlane.xlu1 %314 }
 0x128   :  { %321 = vst.msk [vmem:[%s817_s6 + $0x10] sm:$0xff] %vm318_vm13, %v315_v38  ;;  %v311_v39 = vpop.xlane.xlu0 %310 }
 0x129   :  { %319 = vst.msk [vmem:[%s817_s6] sm:$0xff] %vm318_vm13, %v311_v39 }
 0x12f   :  { %v317_v40 = vpop.xlane.xlu1 %316 }
 0x130   :  { %322 = vst.msk [vmem:[%s817_s6 + $0x18] sm:$0xff] %vm318_vm13, %v317_v40  ;;  %v313_v42 = vpop.xlane.xlu0 %312 }
 0x131   :  { %320 = vst.msk [vmem:[%s817_s6 + $0x8] sm:$0xff] %vm318_vm13, %v313_v42 }
 0x132   :  { %567 = dma.done.wait [#allocation4], 256  }
 0x133   :  { %568 = vsyncadd [#allocation4], 4294967040 }
 0x134   :  { %569 = dma.done.wait [#allocation10], 128  }
 0x135   :  { %570 = vsyncadd [#allocation10], 4294967168 }
 0x136   :  { %359 = vsyncpa [#allocation3], 1 }
 0x137   :  { %360 = vsyncpa [#allocation6], 1 }
 0x138   :  { %361 = vsyncpa [#allocation4], 1 }
 0x139   :  { %362 = vsyncpa [#allocation10], 1 }

// kernel: tpu_custom_call.1
= control target key start
LH: loop header
LB: loop body
LE: loop exit
PB: predicated region body
PF: predicated region fallthrough
CT: control target
= control target key end

     0   :  { %12 = vsyncpa [#allocation3], 0  ;;  %s811_s0 = inlined_call_operand.hbm [shape: bf16[32,32], index: 0, kind: input, shape index: {}]   ;;  %s812_s1 = inlined_call_operand.hbm [shape: bf16[32,128], index: 1, kind: input, shape index: {}]   ;;  %s813_s2 = inlined_call_operand.vmem [shape: f32[1,128], index: 2, kind: input, shape index: {}]   ;;  %s814_s3 = inlined_call_operand.hbm [shape: s8[32,128], index: 3, kind: input, shape index: {}]   ;;  %s815_s4 = inlined_call_operand.hbm [shape: bf16[32,128], index: 4, kind: output, shape index: {0}]   ;;  %s816_s5 = inlined_call_operand.hbm [shape: s8[32,128], index: 5, kind: output, shape index: {1}]   ;;  %s817_s6 = inlined_call_operand.vmem [shape: f32[32,1], index: 6, kind: output, shape index: {2}]  }
   0x1   :  { %13 = vsyncpa [#allocation6], 0 }
   0x2   :  { %14 = vsyncpa [#allocation4], 0 }
   0x3   :  { %15 = vsyncpa [#allocation10], 0  ;;  %s33_s23 = sshll.u32 %s812_s1, 4  ;;  %s571_s24 = smov [#allocation5]   ;;  %s34_s23 = int_to_ptr.hbm [resolvable:$true] %s33_s23 }
   0x4   :  { %s35_s25 = sshll.u32 %s571_s24, 4  ;;  %s20_s28 = sshll.u32 %s811_s0, 4  ;;  %s36_s25 = int_to_ptr.vmem [resolvable:$true] %s35_s25  ;;  %s21_s28 = int_to_ptr.hbm [resolvable:$true] %s20_s28 }
   0x5   :  { %s572_s29 = smov 64   ;;  %s573_s30 = smov 4  }
   0x6   :  { %41 = dma.hbm_to_vmem [thread:$0]  %s34_s23, 256, %s36_s25, [#allocation6], %s572_s29, %s572_s29, %s573_s30  }
   0x7   :  { %s574_s7 = smov [#allocation2]   ;;  %s49_s1 = sshll.u32 %s814_s3, 4  ;;  %s50_s1 = int_to_ptr.hbm [resolvable:$true] %s49_s1 }
   0x8   :  { %s22_s8 = sshll.u32 %s574_s7, 4  ;;  %s575_s0 = smov [#allocation7]   ;;  %s23_s8 = int_to_ptr.vmem [resolvable:$true] %s22_s8 }
   0x9   :  { %28 = dma.hbm_to_vmem [thread:$0]  %s21_s28, 256, %s23_s8, [#allocation3], %s572_s29, %s572_s29, %s573_s30  }
   0xa   :  { %s51_s11 = sshll.u32 %s575_s0, 4  ;;  %s52_s11 = int_to_ptr.vmem [resolvable:$true] %s51_s11 }
   0xb   :  { %54 = dma.hbm_to_vmem [thread:$0]  %s50_s1, 128, %s52_s11, [#allocation6]  }
   0xc   :  { %563 = dma.done.wait [#allocation3], 256  }
   0xd   :  { %564 = vsyncadd [#allocation3], 4294967040 }
   0xe   :  { %565 = dma.done.wait [#allocation6], 384  }
   0xf   :  { %566 = vsyncadd [#allocation6], 4294966912  ;;  %v388_v0 = vld [vmem:[#allocation5 + $0x8] sm:$0xff]  ;;  %v387_v1 = vld [vmem:[#allocation5] sm:$0xff]  ;;  %vm104_vm0 = vcmask 261120   ;;  %v303_v22 = vlaneseq  ;;  %s329_s14 = sshll.u32 %s815_s4, 4  ;;  %s330_s14 = int_to_ptr.hbm [resolvable:$true] %s329_s14 }
  0x10   :  { %117 = vmatpush.bf16.msra.mxu0 %v388_v0  ;;  %400 = vmatpush.bf16.msra.mxu1 %v388_v0  ;;  %v385_v2 = vld [vmem:[#allocation2] sm:$0xff]  ;;  %v386_v3 = vld [vmem:[#allocation2 + $0x8] sm:$0xff]  ;;  %s576_s15 = smov [#allocation8]   ;;  %s578_s4 = smov [#allocation9]  }
  0x11   :  { %v410_v4 = vld [vmem:[%s813_s2] ss:$0 sm:$0xff]  ;;  %v647_v35 = vand.u32 127, %v303_v22  ;;  %s327_s16 = sshll.u32 %s576_s15, 4  ;;  %s341_s17 = sshll.u32 %s578_s4, 4  ;;  %s328_s16 = int_to_ptr.vmem [resolvable:$true] %s327_s16  ;;  %s342_s17 = int_to_ptr.vmem [resolvable:$true] %s341_s17 }
  0x12   :  { %v226_v7 = vld [vmem:[#allocation7] sm:$0xff]  ;;  %s343_s20 = sshll.u32 %s816_s5, 4  ;;  %s344_s20 = int_to_ptr.hbm [resolvable:$true] %s343_s20 }
  0x13   :  { %v229_v13 = vunpack.c.2.s8 %v226_v7  ;;  %v227_v16 = vunpack.c.0.s8 %v226_v7  ;;  %v230_v18 = vunpack.c.3.s8 %v226_v7  ;;  %v228_v19 = vunpack.c.1.s8 %v226_v7 }
  0x14   :  { %118 = vmatpush.bf16.msra.mxu0 %v387_v1  ;;  %401 = vmatpush.bf16.msra.mxu1 %v387_v1  ;;  %vm305_vm1 = vcmp.lt.s32.totalorder %v647_v35, 16 }
  0x15   :  { %v233_v21 = vcvt.s32.f32 %v229_v13  ;;  %v231_v28 = vcvt.s32.f32 %v227_v16  ;;  %v234_v29 = vcvt.s32.f32 %v230_v18  ;;  %v232_v30 = vcvt.s32.f32 %v228_v19 }
  0x17   :  { %379 = vmatmul.msk.bf16.vlgmr.msra.gmra.mxu0 %vm104_vm0, %v385_v2  ;;  %380 = vmatmul.msk.bf16.vlgmr.msra.gmra.mxu1 %vm104_vm0, %v386_v3 }
  0x94   :  { %v120_v5 = vpop.f32.mrf.mxu0  ;;  %v125_v6 = vpop.f32.mrf.mxu1 }
  0x95   :  { %v632_v8 = vadd.f32 %v410_v4, %v120_v5  ;;  %v634_v9 = vadd.f32 %v410_v4, %v125_v6 }
  0x97   :  { %v381_v10 = vmul.f32 -1.442695, %v632_v8  ;;  %v247_v11 = vand.u32 2147483647, %v632_v8  ;;  %v383_v12 = vmul.f32 -1.442695, %v634_v9  ;;  %v241_v34 = vmul.f32 %v233_v21, %v634_v9 }
  0x98   :  { %v249_v14 = vand.u32 2147483647, %v634_v9  ;;  %v237_v40 = vmax.f32 %v634_v9, 0.0  ;;  %v235_v43 = vmax.f32 %v632_v8, 0.0  ;;  %v239_v45 = vmul.f32 %v231_v28, %v632_v8 }
  0x99   :  { %411 = vpow2.f32 %v381_v10  ;;  %v251_v15 = vsub.f32 0.0, %v247_v11 }
  0x9a   :  { %413 = vpow2.f32 %v383_v12  ;;  %v253_v17 = vsub.f32 0.0, %v249_v14  ;;  %v245_v62 = vsub.f32 %v237_v40, %v241_v34  ;;  %v243_v3 = vsub.f32 %v235_v43, %v239_v45 }
  0x9b   :  { %v255_v20 = vmul.f32 1.442695, %v251_v15 }
  0x9c   :  { %v259_v23 = vmul.f32 1.442695, %v253_v17  ;;  %v122_v24 = vpop.f32.mrf.mxu0  ;;  %v127_v25 = vpop.f32.mrf.mxu1 }
  0x9d   :  { %415 = vpow2.f32 %v255_v20  ;;  %v640_v26 = vadd.f32 %v410_v4, %v122_v24  ;;  %v642_v27 = vadd.f32 %v410_v4, %v127_v25 }
  0x9e   :  { %417 = vpow2.f32 %v259_v23 }
  0x9f   :  { %v412_v31 = vpop.eup %411  ;;  %v382_v32 = vmul.f32 -1.442695, %v640_v26  ;;  %v248_v33 = vand.u32 2147483647, %v640_v26  ;;  %v384_v38 = vmul.f32 -1.442695, %v642_v27  ;;  %v242_v46 = vmul.f32 %v234_v29, %v642_v27 }
  0xa0   :  { %v414_v36 = vpop.eup %413  ;;  %v649_v37 = vadd.f32 1.0, %v412_v31  ;;  %v250_v39 = vand.u32 2147483647, %v642_v27  ;;  %v238_v49 = vmax.f32 %v642_v27, 0.0  ;;  %v236_v50 = vmax.f32 %v640_v26, 0.0 }
  0xa1   :  { %v654_v41 = vadd.f32 1.0, %v414_v36  ;;  %419 = vpow2.f32 %v382_v32  ;;  %v252_v42 = vsub.f32 0.0, %v248_v33  ;;  %v240_v57 = vmul.f32 %v232_v30, %v640_v26 }
  0xa2   :  { %421 = vrcp.f32 %v649_v37  ;;  %v254_v44 = vsub.f32 0.0, %v250_v39  ;;  %v157_v0 = vand.u32 2147483648, %v649_v37  ;;  %v672_v5 = vsub.f32 %v238_v49, %v242_v46 }
  0xa3   :  { %v416_v47 = vpop.eup %415  ;;  %423 = vrcp.f32 %v654_v41  ;;  %v257_v48 = vmul.f32 1.442695, %v252_v42  ;;  %v674_v6 = vsub.f32 %v236_v50, %v240_v57  ;;  %v155_v10 = vand.u32 2147483647, %v649_v37 }
  0xa4   :  { %v418_v51 = vpop.eup %417  ;;  %425 = vpow2.f32 %v384_v38  ;;  %v261_v52 = vmul.f32 1.442695, %v254_v44  ;;  %v263_v53 = vadd.f32 1.0, %v416_v47  ;;  %v266_v54 = vmul.f32 -0.5, %v416_v47 }
  0xa5   :  { %427 = vpow2.f32 %v257_v48  ;;  %v281_v55 = vadd.f32 1.0, %v418_v51  ;;  %v284_v56 = vmul.f32 -0.5, %v418_v51  ;;  %v287_v58 = vand.u32 2147483647, %v418_v51 }
  0xa6   :  { %429 = vpow2.f32 %v261_v52  ;;  %v267_v59 = vadd.f32 1.0, %v266_v54  ;;  %v269_v60 = vand.u32 2147483647, %v416_v47  ;;  %vm151_vm4 = vweird.f32 %v649_v37 }
  0xa7   :  { %v420_v61 = vpop.eup %419  ;;  %431 = vlog2.f32 %v281_v55  ;;  %v285_v63 = vadd.f32 1.0, %v284_v56  ;;  %vm680_vm2 = vcmp.lt.f32.partialorder %v287_v58, 0.0004427343  ;;  %v158_v18 = vor.u32 1.1754944e-38, %v157_v0 }
  0xa8   :  { %v665_v1 = vpop.eup %421  ;;  %v667_v2 = vadd.f32 1.0, %v420_v61  ;;  %433 = vlog2.f32 %v263_v53  ;;  %v268_v13 = vmul.f32 %v416_v47, %v267_v59  ;;  %vm684_vm3 = vcmp.lt.f32.partialorder %v269_v60, 0.0004427343 }
  0xa9   :  { %v670_v4 = vpop.eup %423  ;;  %v147_v7 = vmul.f32 %v665_v1, %v649_v37  ;;  %v286_v17 = vmul.f32 %v418_v51, %v285_v63  ;;  %vm152_vm5 = vweird.f32 %v665_v1  ;;  %vm694_vm6 = vcmp.eq.f32.partialorder %v155_v10, 8.507059e+37 }
  0xaa   :  { %v426_v11 = vpop.eup %425  ;;  %435 = vrcp.f32 %v667_v2  ;;  %v170_v23 = vand.u32 2147483647, %v667_v2  ;;  %v177_v34 = vmul.f32 %v670_v4, %v654_v41  ;;  %v172_v39 = vand.u32 2147483648, %v667_v2  ;;  %vm730_vm12 = vmor %vm151_vm4, %vm152_vm5 }
  0xab   :  { %v428_v15 = vpop.eup %427  ;;  %v689_v16 = vadd.f32 1.0, %v426_v11  ;;  %v148_v22 = vsub.f32 1.0, %v147_v7  ;;  %vm166_vm7 = vweird.f32 %v667_v2  ;;  %vm181_vm10 = vweird.f32 %v654_v41 }
  0xac   :  { %v430_v19 = vpop.eup %429  ;;  %v272_v20 = vadd.f32 1.0, %v428_v15  ;;  %v275_v21 = vmul.f32 -0.5, %v428_v15  ;;  %v278_v29 = vand.u32 2147483647, %v428_v15  ;;  %vm712_vm9 = vcmp.eq.f32.partialorder %v170_v23, 8.507059e+37 }
  0xad   :  { %v432_v24 = vpop.eup %431  ;;  %437 = vrcp.f32 %v689_v16  ;;  %v290_v25 = vadd.f32 1.0, %v430_v19  ;;  %v293_v28 = vmul.f32 -0.5, %v430_v19  ;;  %v296_v32 = vand.u32 2147483647, %v430_v19 }
  0xae   :  { %v434_v30 = vpop.eup %433  ;;  %v283_v31 = vmul.f32 0.6931472, %v432_v24  ;;  %439 = vlog2.f32 %v272_v20  ;;  %v276_v38 = vadd.f32 1.0, %v275_v21  ;;  %v149_v44 = vmul.f32 %v665_v1, %v148_v22 }
  0xaf   :  { %v265_v36 = vmul.f32 0.6931472, %v434_v30  ;;  %441 = vlog2.f32 %v290_v25  ;;  %v294_v43 = vadd.f32 1.0, %v293_v28  ;;  %vm707_vm8 = vcmp.lt.f32.partialorder %v278_v29, 0.0004427343 }
  0xb0   :  { %v436_v40 = vpop.eup %435  ;;  %v289_v42 = vsel %vm680_vm2, %v286_v17, %v283_v31  ;;  %vm717_vm11 = vcmp.lt.f32.partialorder %v296_v32, 0.0004427343  ;;  %v150_v52 = vadd.f32 %v665_v1, %v149_v44  ;;  %v178_v53 = vsub.f32 1.0, %v177_v34 }
  0xb1   :  { %v301_v45 = vadd.f32 %v289_v42, %v245_v62  ;;  %v271_v46 = vsel %vm684_vm3, %v268_v13, %v265_v36  ;;  %v162_v48 = vmul.f32 %v436_v40, %v667_v2  ;;  %v277_v56 = vmul.f32 %v428_v15, %v276_v38 }
  0xb2   :  { %v299_v50 = vadd.f32 %v271_v46, %v243_v3  ;;  %v173_v59 = vor.u32 1.1754944e-38, %v172_v39  ;;  %v295_v62 = vmul.f32 %v430_v19, %v294_v43  ;;  %v154_v63 = vsel %vm730_vm12, %v665_v1, %v150_v52 }
  0xb3   :  { %v722_v54 = vpop.eup %437  ;;  %v308_v55 = vsel %vm305_vm1, %v301_v45, 0.0  ;;  %v163_v58 = vsub.f32 1.0, %v162_v48  ;;  %v179_v0 = vmul.f32 %v670_v4, %v178_v53  ;;  %vm167_vm13 = vweird.f32 %v436_v40 }
  0xb4   :  { %v440_v60 = vpop.eup %439  ;;  %314 = vadd.xlane.f32.xlu1 %v308_v55  ;;  %v306_v61 = vsel %vm305_vm1, %v299_v50, 0.0  ;;  %vm182_vm14 = vweird.f32 %v670_v4  ;;  %v185_v11 = vand.u32 2147483647, %v654_v41  ;;  %v187_v12 = vand.u32 2147483648, %v654_v41  ;;  %vm168_vm15 = vmor %vm166_vm7, %vm167_vm13 }
  0xb5   :  { %v442_v3 = vpop.eup %441  ;;  %310 = vadd.xlane.f32.xlu0 %v306_v61  ;;  %v274_v37 = vmul.f32 0.6931472, %v440_v60  ;;  %v164_v7 = vmul.f32 %v436_v40, %v163_v58  ;;  %v192_v13 = vmul.f32 %v722_v54, %v689_v16  ;;  %v159_v14 = vsel %vm694_vm6, %v158_v18, %v154_v63  ;;  %vm767_vm3 = vmor %vm181_vm10, %vm182_vm14 }
  0xb6   :  { %v292_v10 = vmul.f32 0.6931472, %v442_v3  ;;  %v180_v17 = vadd.f32 %v670_v4, %v179_v0  ;;  %vm197_vm0 = vweird.f32 %v722_v54  ;;  %vm196_vm2 = vweird.f32 %v689_v16 }
  0xb7   :  { %v280_v1 = vsel %vm707_vm8, %v277_v56, %v274_v37  ;;  %v165_v15 = vadd.f32 %v436_v40, %v164_v7  ;;  %v193_v21 = vsub.f32 1.0, %v192_v13  ;;  %v200_v18 = vand.u32 2147483647, %v689_v16  ;;  %vm775_vm4 = vmor %vm196_vm2, %vm197_vm0 }
  0xb8   :  { %v298_v19 = vsel %vm717_vm11, %v295_v62, %v292_v10  ;;  %v300_v20 = vadd.f32 %v280_v1, %v674_v6  ;;  %v202_v6 = vand.u32 2147483648, %v689_v16  ;;  %vm214_vm5 = vcmp.gt.f32.partialorder %v632_v8, 0.0 }
  0xb9   :  { %v302_v22 = vadd.f32 %v298_v19, %v672_v5  ;;  %v169_v23 = vsel %vm168_vm15, %v436_v40, %v165_v15  ;;  %v194_v5 = vmul.f32 %v722_v54, %v193_v21  ;;  %vm215_vm6 = vcmp.gt.f32.partialorder %v640_v26, 0.0 }
  0xba   :  { %v307_v24 = vsel %vm305_vm1, %v300_v20, 0.0  ;;  %v174_v25 = vsel %vm712_vm9, %v173_v59, %v169_v23  ;;  %v184_v41 = vsel %vm767_vm3, %v670_v4, %v180_v17  ;;  %vm217_vm7 = vcmp.gt.f32.partialorder %v642_v27, 0.0  ;;  %vm218_vm8 = vmpackc.low %vm215_vm6, %vm214_vm5 }
  0xbb   :  { %v309_v28 = vsel %vm305_vm1, %v302_v22, 0.0  ;;  %v392_v30 = vpack.c.bf16 %v174_v25, %v159_v14  ;;  %v195_v31 = vadd.f32 %v722_v54, %v194_v5  ;;  %vm216_vm1 = vcmp.gt.f32.partialorder %v634_v9, 0.0 }
  0xbc   :  { %316 = vadd.xlane.f32.xlu1 %v309_v28  ;;  %v188_v8 = vor.u32 1.1754944e-38, %v187_v12  ;;  %v203_v35 = vor.u32 1.1754944e-38, %v202_v6  ;;  %vm219_vm9 = vmpackc.low %vm217_vm7, %vm216_vm1  ;;  %v577_v26 = vmov 0   ;;  %vm186_vm10 = vcmp.eq.f32.partialorder %v185_v11, 8.507059e+37 }
  0xbd   :  { %312 = vadd.xlane.f32.xlu0 %v307_v24  ;;  %393 = vst [vmem:[#allocation8] sm:$0xff] %v392_v30   ;;  %v220_v4 = vsel %vm218_vm8, 16711935, %v577_v26  ;;  %v199_v16 = vsel %vm775_vm4, %v722_v54, %v195_v31  ;;  %vm201_vm11 = vcmp.eq.f32.partialorder %v200_v18, 8.507059e+37  ;;  %v221_v32 = vsel %vm219_vm9, 16711935, %v577_v26 }
  0xbe   :  { %v189_v9 = vsel %vm186_vm10, %v188_v8, %v184_v41  ;;  %v204_v27 = vsel %vm201_vm11, %v203_v35, %v199_v16  ;;  %v222_v33 = vpack.c.b8 %v221_v32, %v220_v4  ;;  %vm318_vm13 = vcmask 7168  }
  0xbf   :  { %v397_v34 = vpack.c.bf16 %v204_v27, %v189_v9 }
  0xc0   :  { %vm223_vm12 = vnez %v222_v33 }
  0xc1   :  { %399 = vst [vmem:[#allocation8 + $0x8] sm:$0xff] %v397_v34   ;;  %v224_v36 = vsel %vm223_vm12, 16843009, %v577_v26 }
  0xc2   :  { %335 = dma.vmem_to_hbm [thread:$0]  %s328_s16, 256, %s330_s14, [#allocation4], %s572_s29, %s572_s29, %s573_s30   ;;  %225 = vst [vmem:[#allocation9] sm:$0xff] %v224_v36 }
  0xc3   :  { %346 = dma.vmem_to_hbm [thread:$0]  %s342_s17, 128, %s344_s20, [#allocation10]  }
 0x127   :  { %v315_v38 = vpop.xlane.xlu1 %314 }
 0x128   :  { %321 = vst.msk [vmem:[%s817_s6 + $0x10] sm:$0xff] %vm318_vm13, %v315_v38  ;;  %v311_v39 = vpop.xlane.xlu0 %310 }
 0x129   :  { %319 = vst.msk [vmem:[%s817_s6] sm:$0xff] %vm318_vm13, %v311_v39 }
 0x12f   :  { %v317_v40 = vpop.xlane.xlu1 %316 }
 0x130   :  { %322 = vst.msk [vmem:[%s817_s6 + $0x18] sm:$0xff] %vm318_vm13, %v317_v40  ;;  %v313_v42 = vpop.xlane.xlu0 %312 }
 0x131   :  { %320 = vst.msk [vmem:[%s817_s6 + $0x8] sm:$0xff] %vm318_vm13, %v313_v42 }
 0x132   :  { %567 = dma.done.wait [#allocation4], 256  }
 0x133   :  { %568 = vsyncadd [#allocation4], 4294967040 }
 0x134   :  { %569 = dma.done.wait [#allocation10], 128  }
 0x135   :  { %570 = vsyncadd [#allocation10], 4294967168 }
 0x136   :  { %359 = vsyncpa [#allocation3], 1 }
 0x137   :  { %360 = vsyncpa [#allocation6], 1 }
 0x138   :  { %361 = vsyncpa [#allocation4], 1 }
 0x139   :  { %362 = vsyncpa [#allocation10], 1 }

</bundles_post_ra>
